<compile_context>
chip_gen: v7x
topology: tpu7x:2x2x1
jax: 0.10.0
libtpu: 0.0.40
codegen_flags: <defaults>
</compile_context>

<pallas_src>
import jax
import jax.numpy as jnp
from jax.experimental import pallas as pl
from jax.experimental.pallas import tpu as pltpu

IMG = 28 * 28      # 784
HIDDEN = 128
LATENT = 32
MAX_TB = 512       # batch-tile rows per grid step (multiple of 8)


# --------------------------------------------------------------------------- #
# Kernel
# --------------------------------------------------------------------------- #
def _vae_kernel(x_ref, eps_ref,
                w1_ref, b1_ref,
                wml_ref, bml_ref,
                w3_ref, b3_ref,
                w4_ref, b4_ref,
                recon_ref, muvar_ref):
    x = x_ref[...]                                           # (TB, 784) bf16

    # encoder: Linear(784,128) + ReLU   (bf16 MXU, f32 accumulate/elementwise)
    h = jnp.dot(x, w1_ref[...], preferred_element_type=jnp.float32) + b1_ref[...]
    h = jnp.maximum(h, 0.0)

    # fused fc_mu | fc_logvar: one Linear(128, 64) pass
    ml = jnp.dot(h.astype(jnp.bfloat16), wml_ref[...],
                 preferred_element_type=jnp.float32) + bml_ref[...]
    mu = ml[:, :LATENT]
    logvar = ml[:, LATENT:]

    # reparameterize: z = mu + eps * exp(0.5 * logvar)      (f32, EUP exp)
    std = jnp.exp(0.5 * logvar)
    z = mu + eps_ref[...] * std

    # decoder: Linear(32,128) + ReLU -> Linear(128,784) + Sigmoid
    d = jnp.dot(z.astype(jnp.bfloat16), w3_ref[...],
                preferred_element_type=jnp.float32) + b3_ref[...]
    d = jnp.maximum(d, 0.0)
    logits = jnp.dot(d.astype(jnp.bfloat16), w4_ref[...],
                     preferred_element_type=jnp.float32) + b4_ref[...]

    # sigmoid(x) == 0.5*(tanh(0.5*x)+1): single EUP transcendental, no VPU divide
    recon_ref[...] = 0.5 * (jnp.tanh(0.5 * logits) + 1.0)

    # lane-dense (TB, 64) slab: mu | logvar, split in the wrapper
    muvar_ref[...] = ml


# --------------------------------------------------------------------------- #
# Wrapper
# --------------------------------------------------------------------------- #
def _choose_tb(B):
    """Batch tile: full B when tiny; otherwise >=2 grid steps (v7x megacore),
    capped at MAX_TB (fits v5e/v7x VMEM with double-buffered activation tiles)."""
    if B <= 8:
        return B
    half = -(-B // 2)                      # ceil(B/2)
    return min(MAX_TB, ((half + 7) // 8) * 8)


def _resident_spec(shape):
    """Weights/biases: same block every grid step -> resident in VMEM.
    Single-buffer them (no double-buffering needed for a constant index_map)."""
    try:
        return pl.BlockSpec(shape, lambda i: (0, 0),
                            pipeline_mode=pl.Buffered(buffer_count=1))
    except TypeError:
        # older JAX without pipeline_mode on BlockSpec: default double-buffering
        return pl.BlockSpec(shape, lambda i: (0, 0))


def prepare_params(params):
    """One-time parameter prep (hoisted out of the forward pass):
    fuse fc_mu/fc_logvar into a single (128,64) head and cast weights to bf16."""
    w_ml = jnp.concatenate([params["w_mu"], params["w_lv"]], axis=1)
    b_ml = jnp.concatenate([params["b_mu"], params["b_lv"]], axis=1)
    return dict(
        w1=params["w1"].astype(jnp.bfloat16), b1=params["b1"],
        w_ml=w_ml.astype(jnp.bfloat16),       b_ml=b_ml,
        w3=params["w3"].astype(jnp.bfloat16), b3=params["b3"],
        w4=params["w4"].astype(jnp.bfloat16), b4=params["b4"],
    )


def vae_forward(x_nchw, eps, prep):
    """x_nchw: (B, 1, 28, 28) f32.  eps: (B, LATENT) f32 (torch.randn_like noise).
    prep: output of prepare_params().
    Returns (recon (B,1,28,28) f32, mu (B,LATENT) f32, logvar (B,LATENT) f32)."""
    B = x_nchw.shape[0]
    # nn.Flatten (row-major, same as torch); bf16 halves the dominant HBM read
    x_flat = x_nchw.reshape(B, IMG).astype(jnp.bfloat16)

    TB = _choose_tb(B)
    grid = (pl.cdiv(B, TB),)

    def row_spec(cols):
        return pl.BlockSpec((TB, cols), lambda i: (i, 0))

    in_specs = [
        row_spec(IMG),                                  # x  (bf16)
        row_spec(LATENT),                               # eps (f32)
        _resident_spec((IMG, HIDDEN)),                  # w1  (bf16)
        _resident_spec((1, HIDDEN)),                    # b1  (f32)
        _resident_spec((HIDDEN, 2 * LATENT)),           # w_ml (bf16)
        _resident_spec((1, 2 * LATENT)),                # b_ml (f32)
        _resident_spec((LATENT, HIDDEN)),               # w3  (bf16)
        _resident_spec((1, HIDDEN)),                    # b3  (f32)
        _resident_spec((HIDDEN, IMG)),                  # w4  (bf16)
        _resident_spec((1, IMG)),                       # b4  (f32)
    ]
    out_specs = (row_spec(IMG), row_spec(2 * LATENT))

    flops = 2 * B * (IMG * HIDDEN + HIDDEN * 2 * LATENT
                     + LATENT * HIDDEN + HIDDEN * IMG)
    transcendentals = B * (LATENT + IMG)                # exp(0.5*logvar) + tanh
    bytes_accessed = int(
        2 * B * IMG                                     # x bf16 in
        + 4 * B * IMG                                   # recon f32 out
        + 4 * B * LATENT                                # eps f32 in
        + 4 * B * 2 * LATENT                            # mu|logvar f32 out
        + 2 * (IMG * HIDDEN + HIDDEN * 2 * LATENT
               + LATENT * HIDDEN + HIDDEN * IMG)        # bf16 weights
        + 4 * (HIDDEN + 2 * LATENT + HIDDEN + IMG)      # f32 biases
    )

    recon_flat, muvar = pl.pallas_call(
        _vae_kernel,
        out_shape=(
            jax.ShapeDtypeStruct((B, IMG), jnp.float32),
            jax.ShapeDtypeStruct((B, 2 * LATENT), jnp.float32),
        ),
        grid=grid,
        in_specs=in_specs,
        out_specs=out_specs,
        compiler_params=pltpu.CompilerParams(
            dimension_semantics=("parallel",),          # megacore sharding on v7x
            vmem_limit_bytes=32 * 1024 * 1024,
        ),
        cost_estimate=pl.CostEstimate(
            flops=flops,
            transcendentals=transcendentals,
            bytes_accessed=bytes_accessed),
    )(x_flat, eps, prep["w1"], prep["b1"], prep["w_ml"], prep["b_ml"],
      prep["w3"], prep["b3"], prep["w4"], prep["b4"])

    recon = recon_flat.reshape(B, 1, 28, 28)            # nn.Unflatten(1, (1,28,28))
    mu = muvar[:, :LATENT]
    logvar = muvar[:, LATENT:]
    return recon, mu, logvar


# --------------------------------------------------------------------------- #
# Pure-JAX f32 reference (mirrors the PyTorch module) + init
# --------------------------------------------------------------------------- #
def vae_forward_ref(x_nchw, eps, params):
    B = x_nchw.shape[0]
    x = x_nchw.reshape(B, IMG)
    h = jnp.maximum(x @ params["w1"] + params["b1"], 0.0)
    mu = h @ params["w_mu"] + params["b_mu"]
    logvar = h @ params["w_lv"] + params["b_lv"]
    z = mu + eps * jnp.exp(0.5 * logvar)
    d = jnp.maximum(z @ params["w3"] + params["b3"], 0.0)
    recon = jax.nn.sigmoid(d @ params["w4"] + params["b4"])
    return recon.reshape(B, 1, 28, 28), mu, logvar


def init_params(key):
    """PyTorch-style nn.Linear init: U(-1/sqrt(fan_in), 1/sqrt(fan_in)).
    Weights stored as (in_features, out_features)."""
    def linear(key, fan_in, fan_out):
        kw, kb = jax.random.split(key)
        bound = 1.0 / jnp.sqrt(fan_in)
        w = jax.random.uniform(kw, (fan_in, fan_out), jnp.float32, -bound, bound)
        b = jax.random.uniform(kb, (1, fan_out), jnp.float32, -bound, bound)
        return w, b

    k1, k2, k3, k4, k5 = jax.random.split(key, 5)
    w1, b1 = linear(k1, IMG, HIDDEN)
    w_mu, b_mu = linear(k2, HIDDEN, LATENT)
    w_lv, b_lv = linear(k3, HIDDEN, LATENT)
    w3, b3 = linear(k4, LATENT, HIDDEN)
    w4, b4 = linear(k5, HIDDEN, IMG)
    return dict(w1=w1, b1=b1, w_mu=w_mu, b_mu=b_mu, w_lv=w_lv, b_lv=b_lv,
                w3=w3, b3=b3, w4=w4, b4=b4)


if __name__ == "__main__":
    key = jax.random.PRNGKey(0)
    k_params, k_x, k_eps = jax.random.split(key, 3)

    B = 2
    params = init_params(k_params)
    prep = prepare_params(params)                                  # one-time prep
    x = jax.random.uniform(k_x, (B, 1, 28, 28), jnp.float32)       # image-like input
    eps = jax.random.normal(k_eps, (B, LATENT), jnp.float32)       # torch.randn_like(std)

    recon, mu, logvar = jax.block_until_ready(
        jax.jit(vae_forward)(x, eps, prep))
    recon_r, mu_r, logvar_r = jax.jit(vae_forward_ref)(x, eps, params)

    assert recon.shape == (B, 1, 28, 28)
    assert mu.shape == (B, LATENT)
    assert logvar.shape == (B, LATENT)
    assert bool(jnp.all(jnp.isfinite(recon)))
    assert bool(jnp.all((recon >= 0.0) & (recon <= 1.0)))          # sigmoid range
    # bf16 matmul operands (f32 accumulation) -> loosened tolerance vs f32 reference
    assert bool(jnp.allclose(recon, recon_r, atol=2e-2, rtol=2e-2))
    assert bool(jnp.allclose(mu, mu_r, atol=2e-2, rtol=2e-2))
    assert bool(jnp.allclose(logvar, logvar_r, atol=2e-2, rtol=2e-2))
    print("KERNEL_OK")
</pallas_src>

<mosaic_0001>
module attributes {stable_mosaic.version = 11 : i64} {
  func.func @_vae_kernel(%arg0: i32, %arg1: memref<2x784xbf16, #tpu.memory_space<vmem>>, %arg2: memref<2x32xf32, #tpu.memory_space<vmem>>, %arg3: memref<784x128xbf16, #tpu.memory_space<vmem>>, %arg4: memref<1x128xf32, #tpu.memory_space<vmem>>, %arg5: memref<128x64xbf16, #tpu.memory_space<vmem>>, %arg6: memref<1x64xf32, #tpu.memory_space<vmem>>, %arg7: memref<32x128xbf16, #tpu.memory_space<vmem>>, %arg8: memref<1x128xf32, #tpu.memory_space<vmem>>, %arg9: memref<128x784xbf16, #tpu.memory_space<vmem>>, %arg10: memref<1x784xf32, #tpu.memory_space<vmem>>, %arg11: memref<2x784xf32, #tpu.memory_space<vmem>>, %arg12: memref<2x64xf32, #tpu.memory_space<vmem>>) attributes {dimension_semantics = [#tpu.dimension_semantics<parallel>], iteration_bounds = array<i64: 1>, scalar_prefetch = 0 : i64, scratch_operands = 0 : i64, tpu.core_type = #tpu.core_type<tc>, window_params = [{transform_indices = @transform_0, window_bounds = array<i64: 2, 784>}, {transform_indices = @transform_1, window_bounds = array<i64: 2, 32>}, {pipeline_mode = #tpu.pipeline_mode<synchronous>, transform_indices = @transform_2, window_bounds = array<i64: 784, 128>}, {pipeline_mode = #tpu.pipeline_mode<synchronous>, transform_indices = @transform_3, window_bounds = array<i64: 1, 128>}, {pipeline_mode = #tpu.pipeline_mode<synchronous>, transform_indices = @transform_4, window_bounds = array<i64: 128, 64>}, {pipeline_mode = #tpu.pipeline_mode<synchronous>, transform_indices = @transform_5, window_bounds = array<i64: 1, 64>}, {pipeline_mode = #tpu.pipeline_mode<synchronous>, transform_indices = @transform_6, window_bounds = array<i64: 32, 128>}, {pipeline_mode = #tpu.pipeline_mode<synchronous>, transform_indices = @transform_7, window_bounds = array<i64: 1, 128>}, {pipeline_mode = #tpu.pipeline_mode<synchronous>, transform_indices = @transform_8, window_bounds = array<i64: 128, 784>}, {pipeline_mode = #tpu.pipeline_mode<synchronous>, transform_indices = @transform_9, window_bounds = array<i64: 1, 784>}, {transform_indices = @transform_10, window_bounds = array<i64: 2, 784>}, {transform_indices = @transform_11, window_bounds = array<i64: 2, 64>}]} {
    %c0 = arith.constant 0 : index
    %c0_0 = arith.constant 0 : index
    %0 = vector.load %arg1[%c0, %c0_0] : memref<2x784xbf16, #tpu.memory_space<vmem>>, vector<2x784xbf16>
    %c0_1 = arith.constant 0 : index
    %c0_2 = arith.constant 0 : index
    %1 = vector.load %arg3[%c0_1, %c0_2] : memref<784x128xbf16, #tpu.memory_space<vmem>>, vector<784x128xbf16>
    %cst = arith.constant dense<0.000000e+00> : vector<2x128xf32>
    %2 = tpu.matmul %0, %1, %cst {dimension_numbers = #tpu.dot_dimension_numbers<[1], [0], [0], [1], [0, 0, 1, 1], [], []>} : vector<2x784xbf16>, vector<784x128xbf16>, vector<2x128xf32> -> vector<2x128xf32>
    %c0_3 = arith.constant 0 : index
    %c0_4 = arith.constant 0 : index
    %3 = vector.load %arg4[%c0_3, %c0_4] : memref<1x128xf32, #tpu.memory_space<vmem>>, vector<1x128xf32>
    %4 = vector.broadcast %3 : vector<1x128xf32> to vector<2x128xf32>
    %5 = arith.addf %2, %4 : vector<2x128xf32>
    %cst_5 = arith.constant 0.000000e+00 : f32
    %6 = vector.broadcast %cst_5 : f32 to vector<2x128xf32>
    %7 = arith.maximumf %5, %6 : vector<2x128xf32>
    %8 = arith.truncf %7 : vector<2x128xf32> to vector<2x128xbf16>
    %c0_6 = arith.constant 0 : index
    %c0_7 = arith.constant 0 : index
    %9 = vector.load %arg5[%c0_6, %c0_7] : memref<128x64xbf16, #tpu.memory_space<vmem>>, vector<128x64xbf16>
    %cst_8 = arith.constant dense<0.000000e+00> : vector<2x64xf32>
    %10 = tpu.matmul %8, %9, %cst_8 {dimension_numbers = #tpu.dot_dimension_numbers<[1], [0], [0], [1], [0, 0, 1, 1], [], []>} : vector<2x128xbf16>, vector<128x64xbf16>, vector<2x64xf32> -> vector<2x64xf32>
    %c0_9 = arith.constant 0 : index
    %c0_10 = arith.constant 0 : index
    %11 = vector.load %arg6[%c0_9, %c0_10] : memref<1x64xf32, #tpu.memory_space<vmem>>, vector<1x64xf32>
    %12 = vector.broadcast %11 : vector<1x64xf32> to vector<2x64xf32>
    %13 = arith.addf %10, %12 : vector<2x64xf32>
    %14 = vector.extract_strided_slice %13 {offsets = [0, 0], sizes = [2, 32], strides = [1, 1]} : vector<2x64xf32> to vector<2x32xf32>
    %15 = vector.extract_strided_slice %13 {offsets = [0, 32], sizes = [2, 32], strides = [1, 1]} : vector<2x64xf32> to vector<2x32xf32>
    %cst_11 = arith.constant 5.000000e-01 : f32
    %16 = vector.broadcast %cst_11 : f32 to vector<2x32xf32>
    %17 = arith.mulf %16, %15 : vector<2x32xf32>
    %18 = math.exp %17 : vector<2x32xf32>
    %c0_12 = arith.constant 0 : index
    %c0_13 = arith.constant 0 : index
    %19 = vector.load %arg2[%c0_12, %c0_13] : memref<2x32xf32, #tpu.memory_space<vmem>>, vector<2x32xf32>
    %20 = arith.mulf %19, %18 : vector<2x32xf32>
    %21 = arith.addf %14, %20 : vector<2x32xf32>
    %22 = arith.truncf %21 : vector<2x32xf32> to vector<2x32xbf16>
    %c0_14 = arith.constant 0 : index
    %c0_15 = arith.constant 0 : index
    %23 = vector.load %arg7[%c0_14, %c0_15] : memref<32x128xbf16, #tpu.memory_space<vmem>>, vector<32x128xbf16>
    %cst_16 = arith.constant dense<0.000000e+00> : vector<2x128xf32>
    %24 = tpu.matmul %22, %23, %cst_16 {dimension_numbers = #tpu.dot_dimension_numbers<[1], [0], [0], [1], [0, 0, 1, 1], [], []>} : vector<2x32xbf16>, vector<32x128xbf16>, vector<2x128xf32> -> vector<2x128xf32>
    %c0_17 = arith.constant 0 : index
    %c0_18 = arith.constant 0 : index
    %25 = vector.load %arg8[%c0_17, %c0_18] : memref<1x128xf32, #tpu.memory_space<vmem>>, vector<1x128xf32>
    %26 = vector.broadcast %25 : vector<1x128xf32> to vector<2x128xf32>
    %27 = arith.addf %24, %26 : vector<2x128xf32>
    %cst_19 = arith.constant 0.000000e+00 : f32
    %28 = vector.broadcast %cst_19 : f32 to vector<2x128xf32>
    %29 = arith.maximumf %27, %28 : vector<2x128xf32>
    %30 = arith.truncf %29 : vector<2x128xf32> to vector<2x128xbf16>
    %c0_20 = arith.constant 0 : index
    %c0_21 = arith.constant 0 : index
    %31 = vector.load %arg9[%c0_20, %c0_21] : memref<128x784xbf16, #tpu.memory_space<vmem>>, vector<128x784xbf16>
    %cst_22 = arith.constant dense<0.000000e+00> : vector<2x784xf32>
    %32 = tpu.matmul %30, %31, %cst_22 {dimension_numbers = #tpu.dot_dimension_numbers<[1], [0], [0], [1], [0, 0, 1, 1], [], []>} : vector<2x128xbf16>, vector<128x784xbf16>, vector<2x784xf32> -> vector<2x784xf32>
    %c0_23 = arith.constant 0 : index
    %c0_24 = arith.constant 0 : index
    %33 = vector.load %arg10[%c0_23, %c0_24] : memref<1x784xf32, #tpu.memory_space<vmem>>, vector<1x784xf32>
    %34 = vector.broadcast %33 : vector<1x784xf32> to vector<2x784xf32>
    %35 = arith.addf %32, %34 : vector<2x784xf32>
    %cst_25 = arith.constant 5.000000e-01 : f32
    %36 = vector.broadcast %cst_25 : f32 to vector<2x784xf32>
    %37 = arith.mulf %36, %35 : vector<2x784xf32>
    %38 = math.tanh %37 : vector<2x784xf32>
    %cst_26 = arith.constant 1.000000e+00 : f32
    %39 = vector.broadcast %cst_26 : f32 to vector<2x784xf32>
    %40 = arith.addf %38, %39 : vector<2x784xf32>
    %cst_27 = arith.constant 5.000000e-01 : f32
    %41 = vector.broadcast %cst_27 : f32 to vector<2x784xf32>
    %42 = arith.mulf %41, %40 : vector<2x784xf32>
    %c0_28 = arith.constant 0 : index
    %c0_29 = arith.constant 0 : index
    %43 = vector.load %arg11[%c0_28, %c0_29] : memref<2x784xf32, #tpu.memory_space<vmem>>, vector<2x784xf32>
    tpu.vector_store %arg11[%c0_28, %c0_29], %42 {strides = array<i32>} : memref<2x784xf32, #tpu.memory_space<vmem>>, vector<2x784xf32>,
    %c0_30 = arith.constant 0 : index
    %c0_31 = arith.constant 0 : index
    %44 = vector.load %arg12[%c0_30, %c0_31] : memref<2x64xf32, #tpu.memory_space<vmem>>, vector<2x64xf32>
    tpu.vector_store %arg12[%c0_30, %c0_31], %13 {strides = array<i32>} : memref<2x64xf32, #tpu.memory_space<vmem>>, vector<2x64xf32>,
    return
  }
  func.func @transform_0(%arg0: i32) -> (i32, i32) {
    %c0_i32 = arith.constant 0 : i32
    %c0_i32_0 = arith.constant 0 : i32
    return %arg0, %c0_i32 : i32, i32
  }
  func.func @transform_1(%arg0: i32) -> (i32, i32) {
    %c0_i32 = arith.constant 0 : i32
    %c0_i32_0 = arith.constant 0 : i32
    return %arg0, %c0_i32 : i32, i32
  }
  func.func @transform_2(%arg0: i32) -> (i32, i32) {
    %c0_i32 = arith.constant 0 : i32
    %c0_i32_0 = arith.constant 0 : i32
    %c0_i32_1 = arith.constant 0 : i32
    return %c0_i32, %c0_i32_0 : i32, i32
  }
  func.func @transform_3(%arg0: i32) -> (i32, i32) {
    %c0_i32 = arith.constant 0 : i32
    %c0_i32_0 = arith.constant 0 : i32
    %c0_i32_1 = arith.constant 0 : i32
    return %c0_i32, %c0_i32_0 : i32, i32
  }
  func.func @transform_4(%arg0: i32) -> (i32, i32) {
    %c0_i32 = arith.constant 0 : i32
    %c0_i32_0 = arith.constant 0 : i32
    %c0_i32_1 = arith.constant 0 : i32
    return %c0_i32, %c0_i32_0 : i32, i32
  }
  func.func @transform_5(%arg0: i32) -> (i32, i32) {
    %c0_i32 = arith.constant 0 : i32
    %c0_i32_0 = arith.constant 0 : i32
    %c0_i32_1 = arith.constant 0 : i32
    return %c0_i32, %c0_i32_0 : i32, i32
  }
  func.func @transform_6(%arg0: i32) -> (i32, i32) {
    %c0_i32 = arith.constant 0 : i32
    %c0_i32_0 = arith.constant 0 : i32
    %c0_i32_1 = arith.constant 0 : i32
    return %c0_i32, %c0_i32_0 : i32, i32
  }
  func.func @transform_7(%arg0: i32) -> (i32, i32) {
    %c0_i32 = arith.constant 0 : i32
    %c0_i32_0 = arith.constant 0 : i32
    %c0_i32_1 = arith.constant 0 : i32
    return %c0_i32, %c0_i32_0 : i32, i32
  }
  func.func @transform_8(%arg0: i32) -> (i32, i32) {
    %c0_i32 = arith.constant 0 : i32
    %c0_i32_0 = arith.constant 0 : i32
    %c0_i32_1 = arith.constant 0 : i32
    return %c0_i32, %c0_i32_0 : i32, i32
  }
  func.func @transform_9(%arg0: i32) -> (i32, i32) {
    %c0_i32 = arith.constant 0 : i32
    %c0_i32_0 = arith.constant 0 : i32
    %c0_i32_1 = arith.constant 0 : i32
    return %c0_i32, %c0_i32_0 : i32, i32
  }
  func.func @transform_10(%arg0: i32) -> (i32, i32) {
    %c0_i32 = arith.constant 0 : i32
    %c0_i32_0 = arith.constant 0 : i32
    return %arg0, %c0_i32 : i32, i32
  }
  func.func @transform_11(%arg0: i32) -> (i32, i32) {
    %c0_i32 = arith.constant 0 : i32
    %c0_i32_0 = arith.constant 0 : i32
    return %arg0, %c0_i32 : i32, i32
  }
}

</mosaic_0001>

<bundles_post_ra>
// kernel: vae_forward.1
= control target key start
LH: loop header
LB: loop body
LE: loop exit
PB: predicated region body
PF: predicated region fallthrough
CT: control target
= control target key end

     0   :  { %v1914_v21 = vmov 1966171168   ;;  %v149_v23 = vlaneseq  ;;  %v1915_v45 = vmov 0.0   ;;  %vm1916_vm0 = vmmov 0   ;;  %s1917_s28 = smov 96   ;;  %s2390_s2 = inlined_call_operand.vmem [shape: bf16[784,128], index: 2, kind: input, shape index: {}]   ;;  %s2391_s0 = inlined_call_operand.vmem [shape: bf16[2,784], index: 0, kind: input, shape index: {}]   ;;  %s2392_s4 = inlined_call_operand.vmem [shape: bf16[128,64], index: 4, kind: input, shape index: {}]   ;;  %s2393_s3 = inlined_call_operand.vmem [shape: f32[1,128], index: 3, kind: input, shape index: {}]   ;;  %s2394_s6 = inlined_call_operand.vmem [shape: bf16[32,128], index: 6, kind: input, shape index: {}]   ;;  %s2395_s5 = inlined_call_operand.vmem [shape: f32[1,64], index: 5, kind: input, shape index: {}]   ;;  %s2396_s11 = inlined_call_operand.vmem [shape: f32[2,64], index: 11, kind: output, shape index: {1}]   ;;  %s2397_s8 = inlined_call_operand.vmem [shape: bf16[128,784], index: 8, kind: input, shape index: {}]   ;;  %s2398_s1 = inlined_call_operand.vmem [shape: f32[2,32], index: 1, kind: input, shape index: {}]   ;;  %s2399_s7 = inlined_call_operand.vmem [shape: f32[1,128], index: 7, kind: input, shape index: {}]   ;;  %s2400_s9 = inlined_call_operand.vmem [shape: f32[1,784], index: 9, kind: input, shape index: {}]   ;;  %s2401_s10 = inlined_call_operand.vmem [shape: f32[2,784], index: 10, kind: output, shape index: {0}]  }
   0x1   :  { %v1758_v0 = vld [vmem:[%s2390_s2 + $0x40] sm:$0xff]   ;;  %v1762_v4 = vld [vmem:[%s2390_s2 + $0x48] sm:$0xff]   ;;  %v1766_v8 = vld [vmem:[%s2390_s2 + $0x50] sm:$0xff]   ;;  %v147_v22 = vunpack.c.l.s4 %v1914_v21  ;;  %vm493_vm1 = vcmask 130048   ;;  %vm1479_vm2 = vcmask 517120   ;;  %vm804_vm3 = vcmask 261120  }
   0x2   :  { %v1759_v1 = vld [vmem:[%s2390_s2] sm:$0xff]   ;;  %1609 = vmatprep.subr.bf16.mxu0 %v1758_v0  ;;  %v1763_v5 = vld [vmem:[%s2390_s2 + $0x8] sm:$0xff]   ;;  %v1767_v9 = vld [vmem:[%s2390_s2 + $0x10] sm:$0xff]   ;;  %v2055_v29 = vshrl.u32 %v149_v23, 7  ;;  %vm1473_vm4 = vcmask 1041408   ;;  %vm1474_vm5 = vcmask 1043458  }
   0x3   :  { %v1760_v2 = vld [vmem:[%s2390_s2 + $0xc0] sm:$0xff]   ;;  %1610 = vmatpush3.bf16.msra.mxu0 %v1759_v1  ;;  %v1764_v6 = vld [vmem:[%s2390_s2 + $0xc8] sm:$0xff]   ;;  %v1768_v10 = vld [vmem:[%s2390_s2 + $0xd0] sm:$0xff]   ;;  %v148_v28 = vunpack.c.0.s8 %v147_v22  ;;  %vm1476_vm7 = vcmask 128004  }
   0x4   :  { %v1761_v3 = vld [vmem:[%s2390_s2 + $0x80] sm:$0xff]   ;;  %1631 = vmatprep.subr.bf16.mxu1 %v1760_v2  ;;  %1611 = vmatprep.subr.bf16.mxu0 %v1762_v4  ;;  %v1765_v7 = vld [vmem:[%s2390_s2 + $0x88] sm:$0xff]   ;;  %v1769_v11 = vld [vmem:[%s2390_s2 + $0x90] sm:$0xff]  }
   0x5   :  { %1632 = vmatpush3.bf16.msra.mxu1 %v1761_v3  ;;  %v1770_v12 = vld [vmem:[%s2390_s2 + $0x58] sm:$0xff]   ;;  %v1774_v16 = vld [vmem:[%s2390_s2 + $0x60] sm:$0xff]   ;;  %v1778_v20 = vld [vmem:[%s2390_s2 + $0x68] sm:$0xff]   ;;  %v151_v34 = vsub.s32 %v148_v28, %v2055_v29 }
   0x6   :  { %1633 = vmatprep.subr.bf16.mxu1 %v1764_v6  ;;  %v1771_v13 = vld [vmem:[%s2390_s2 + $0x18] sm:$0xff]   ;;  %v1775_v17 = vld [vmem:[%s2390_s2 + $0x20] sm:$0xff]   ;;  %v1779_v24 = vld [vmem:[%s2390_s2 + $0x28] sm:$0xff]  }
   0x7   :  { %1612 = vmatpush3.bf16.msra.mxu0 %v1763_v5  ;;  %v1772_v14 = vld [vmem:[%s2390_s2 + $0xd8] sm:$0xff]   ;;  %v1776_v18 = vld [vmem:[%s2390_s2 + $0xe0] sm:$0xff]   ;;  %v1780_v25 = vld [vmem:[%s2390_s2 + $0xe8] sm:$0xff]  }
   0x8   :  { %1613 = vmatprep.subr.bf16.mxu0 %v1766_v8  ;;  %v1773_v15 = vld [vmem:[%s2390_s2 + $0x98] sm:$0xff]   ;;  %v1777_v19 = vld [vmem:[%s2390_s2 + $0xa0] sm:$0xff]   ;;  %v1781_v26 = vld [vmem:[%s2390_s2 + $0xa8] sm:$0xff]  }
   0x9   :  { %1634 = vmatpush3.bf16.msra.mxu1 %v1765_v7  ;;  %v1782_v27 = vld [vmem:[%s2390_s2 + $0x70] sm:$0xff]   ;;  %v1786_v33 = vld [vmem:[%s2390_s2 + $0x78] sm:$0xff]   ;;  %v38_v37 = vld [vmem:[%s2391_s0] sm:$0x7f] }
   0xa   :  { %1635 = vmatprep.subr.bf16.mxu1 %v1768_v10  ;;  %v1783_v30 = vld [vmem:[%s2390_s2 + $0x30] sm:$0xff]   ;;  %v1787_v35 = vld [vmem:[%s2390_s2 + $0x38] sm:$0xff]   ;;  %v145_v38 = vcombine.high %v38_v37, %v38_v37  ;;  %v152_v39 = vrot.slane %v38_v37, %v151_v34  ;;  %v1791_v41 = vld [vmem:[%s2390_s2 + $0x140] sm:$0xff]  }
   0xb   :  { %1614 = vmatpush3.bf16.msra.mxu0 %v1767_v9  ;;  %v1784_v31 = vld [vmem:[%s2390_s2 + $0xf0] sm:$0xff]   ;;  %v1788_v36 = vld [vmem:[%s2390_s2 + $0xf8] sm:$0xff]   ;;  %v1792_v47 = vld [vmem:[%s2390_s2 + $0x100] sm:$0xff]  }
   0xc   :  { %1615 = vmatprep.subr.bf16.mxu0 %v1770_v12  ;;  %v1785_v32 = vld [vmem:[%s2390_s2 + $0xb0] sm:$0xff]   ;;  %v1790_v40 = vld [vmem:[%s2390_s2 + $0xb8] sm:$0xff]   ;;  %v160_v42 = vcombine.high %v152_v39, %v152_v39  ;;  %v168_v43 = vrot.slane %v152_v39, %v151_v34  ;;  %v159_v44 = vrot.slane %v145_v38, %v151_v34  ;;  %v1793_v50 = vld [vmem:[%s2390_s2 + $0x148] sm:$0xff]  }
   0xd   :  { %1636 = vmatpush3.bf16.msra.mxu1 %v1769_v11  ;;  %v1794_v53 = vld [vmem:[%s2390_s2 + $0x108] sm:$0xff]   ;;  %v1795_v54 = vld [vmem:[%s2390_s2 + $0x150] sm:$0xff]   ;;  %v1797_v56 = vld [vmem:[%s2390_s2 + $0x158] sm:$0xff]  }
   0xe   :  { %1637 = vmatprep.subr.bf16.mxu1 %v1772_v14  ;;  %v182_v46 = vrot.slane %v160_v42, %v151_v34  ;;  %v161_v48 = vcombine.high %v159_v44, %v159_v44  ;;  %v190_v49 = vcombine.high %v168_v43, %v168_v43  ;;  %v1796_v55 = vld [vmem:[%s2390_s2 + $0x110] sm:$0xff]   ;;  %v175_v57 = vrot.slane %v159_v44, %v151_v34  ;;  %v1798_v58 = vld [vmem:[%s2390_s2 + $0x118] sm:$0xff]   ;;  %v1799_v59 = vld [vmem:[%s2390_s2 + $0x160] sm:$0xff]  }
   0xf   :  { %1616 = vmatpush3.bf16.msra.mxu0 %v1771_v13  ;;  %v1807_v60 = vld [vmem:[%s2390_s2 + $0x180] sm:$0xff]   ;;  %v1801_v63 = vld [vmem:[%s2390_s2 + $0x168] sm:$0xff]   ;;  %v1803_v1 = vld [vmem:[%s2390_s2 + $0x170] sm:$0xff]  }
  0x10   :  { %1617 = vmatprep.subr.bf16.mxu0 %v1774_v16  ;;  %529 = vmatprep.mubr.bf16.mxu0 %v182_v46  ;;  %v192_v51 = vcombine.high %v182_v46, %v182_v46  ;;  %v189_v52 = vrot.slane %v161_v48, %v151_v34  ;;  %v191_v61 = vcombine.high %v175_v57, %v175_v57  ;;  %v1800_v62 = vld [vmem:[%s2390_s2 + $0x120] sm:$0xff]   ;;  %v1802_v0 = vld [vmem:[%s2390_s2 + $0x128] sm:$0xff]   ;;  %v1804_v2 = vld [vmem:[%s2390_s2 + $0x130] sm:$0xff]  }
  0x11   :  { %1638 = vmatpush3.bf16.msra.mxu1 %v1773_v15  ;;  %v1805_v3 = vld [vmem:[%s2390_s2 + $0x178] sm:$0xff]   ;;  %v1808_v5 = vld [vmem:[%s2392_s4] sm:$0xff]   ;;  %v1809_v6 = vld [vmem:[%s2392_s4 + $0x8] sm:$0xff]  }
  0x12   :  { %1639 = vmatprep.subr.bf16.mxu1 %v1776_v18  ;;  %569 = vmatprep.mubr.bf16.mxu1 %v192_v51  ;;  %v1806_v4 = vld [vmem:[%s2390_s2 + $0x138] sm:$0xff]   ;;  %v1810_v7 = vld [vmem:[%s2392_s4 + $0x10] sm:$0xff]   ;;  %v1812_v9 = vld [vmem:[%s2392_s4 + $0x20] sm:$0xff]  }
  0x13   :  { %1618 = vmatpush3.bf16.msra.mxu0 %v1775_v17  ;;  %v1811_v8 = vld [vmem:[%s2392_s4 + $0x18] sm:$0xff]   ;;  %v1813_v10 = vld [vmem:[%s2392_s4 + $0x28] sm:$0xff]   ;;  %v1814_v11 = vld [vmem:[%s2392_s4 + $0x30] sm:$0xff]  }
  0x14   :  { %1619 = vmatprep.subr.bf16.mxu0 %v1778_v20  ;;  %v1815_v12 = vld [vmem:[%s2392_s4 + $0x38] sm:$0xff]   ;;  %v1489_v14 = vld [vmem:[%s2393_s3] ss:$0 sm:$0xff]  ;;  %vm1475_vm6 = vmor %vm1474_vm5, %vm1473_vm4 }
  0x15   :  { %1640 = vmatpush3.bf16.msra.mxu1 %v1777_v19  ;;  %v1820_v51 = vld [vmem:[%s2397_s8 + $0x4] ss:$28 sps:$4 sm:$0xff]   ;;  %vm1477_vm8 = vmor %vm1476_vm7, %vm1475_vm6 }
  0x16   :  { %1641 = vmatprep.subr.bf16.mxu1 %v1780_v25 }
  0x17   :  { %1620 = vmatpush3.bf16.msra.mxu0 %v1779_v24 }
  0x18   :  { %1621 = vmatprep.subr.bf16.mxu0 %v1782_v27 }
  0x19   :  { %1642 = vmatpush3.bf16.msra.mxu1 %v1781_v26 }
  0x1a   :  { %1643 = vmatprep.subr.bf16.mxu1 %v1784_v31 }
  0x1b   :  { %1622 = vmatpush3.bf16.msra.mxu0 %v1783_v30 }
  0x1c   :  { %1623 = vmatprep.subr.bf16.mxu0 %v1786_v33 }
  0x1d   :  { %1644 = vmatpush3.bf16.msra.mxu1 %v1785_v32 }
  0x1e   :  { %1645 = vmatprep.subr.bf16.mxu1 %v1788_v36 }
  0x1f   :  { %1624 = vmatpush3.bf16.msra.mxu0 %v1787_v35 }
  0x20   :  { %1653 = vmatprep.subr.bf16.mxu0 %v1791_v41  ;;  %v1540_v41 = vld [vmem:[%s2395_s5] ss:$0 sm:$0xff] }
  0x21   :  { %1646 = vmatpush3.bf16.msra.mxu1 %v1790_v40  ;;  %v1816_v40 = vld [vmem:[%s2394_s6] sm:$0xff]  }
  0x22   :  { %1698 = vmatprep.subr.bf16.mxu1 %v1915_v45  ;;  %530 = vmatmul.mubr.bf16.vlgmr.msra.gmra.mrb[0].mxu0 %v168_v43 }
  0x23   :  { %1654 = vmatpush3.bf16.msra.mxu0 %v1792_v47  ;;  %609 = vmatprep.mubr.bf16.mxu0 %v189_v52  ;;  %v1821_v52 = vld [vmem:[%s2397_s8 + $0x8] ss:$28 sps:$4 sm:$0xff]  }
  0x24   :  { %570 = vmatmul.mubr.bf16.vlgmr.msra.gmra.mrb[0].mxu1 %v190_v49  ;;  %1655 = vmatprep.subr.bf16.mxu0 %v1793_v50  ;;  %v1817_v50 = vld [vmem:[%s2394_s6 + $0x8] sm:$0xff]  }
  0x25   :  { %1700 = vmatprep.mubr.msk.bf16.mxu1 %vm1916_vm0, %v1915_v45  ;;  %1699 = vmatpush3.bf16.msra.mxu1 %v1807_v60  ;;  %v1839_v60 = vld [vmem:[%s2397_s8 + $0xb0] ss:$28 sps:$4 sm:$0xff]  }
  0x26   :  { %1704 = vmatprep.subr.bf16.mxu1 %v1915_v45 }
  0x27   :  { %1656 = vmatpush3.bf16.msra.mxu0 %v1794_v53  ;;  %v1823_v53 = vld [vmem:[%s2397_s8 + $0xc] ss:$28 sps:$4 sm:$0xff]  }
  0x28   :  { %1657 = vmatprep.subr.bf16.mxu0 %v1795_v54  ;;  %v1827_v54 = vld [vmem:[%s2397_s8 + $0x40] ss:$28 sps:$4 sm:$0xff]  }
  0x2b   :  { %1658 = vmatpush3.bf16.msra.mxu0 %v1796_v55 }
  0x2c   :  { %1659 = vmatprep.subr.bf16.mxu0 %v1797_v56  ;;  %1701 = vmatmul.mubr.msk.bf16.vlgmr.msra.gmra.mrb[4].mxu1 %vm493_vm1, %v191_v61  ;;  %v1829_v56 = vld [vmem:[%s2397_s8 + $0x44] ss:$28 sps:$4 sm:$0xff]   ;;  %v1847_v61 = vld [vmem:[%s2397_s8 + $0xec] ss:$28 sps:$4 sm:$0xff]  }
  0x2d   :  { %1720 = vmatprep.mubr.msk.bf16.mxu1 %vm1916_vm0, %v1915_v45  ;;  %1705 = vmatpush3.bf16.msra.mxu1 %v1808_v5 }
  0x2e   :  { %1706 = vmatprep.subr.bf16.mxu1 %v1915_v45 }
  0x2f   :  { %1660 = vmatpush3.bf16.msra.mxu0 %v1798_v58  ;;  %v1833_v58 = vld [vmem:[%s2397_s8 + $0x78] ss:$28 sps:$4 sm:$0xff]  }
  0x30   :  { %1661 = vmatprep.subr.bf16.mxu0 %v1799_v59  ;;  %v1841_v59 = vld [vmem:[%s2397_s8 + $0xb4] ss:$28 sps:$4 sm:$0xff]  }
  0x31   :  { %1707 = vmatpush3.bf16.msra.mxu1 %v1809_v6 }
  0x32   :  { %1708 = vmatprep.subr.bf16.mxu1 %v1915_v45 }
  0x33   :  { %1662 = vmatpush3.bf16.msra.mxu0 %v1800_v62  ;;  %v1845_v62 = vld [vmem:[%s2397_s8 + $0xe8] ss:$28 sps:$4 sm:$0xff]  }
  0x34   :  { %1663 = vmatprep.subr.bf16.mxu0 %v1801_v63  ;;  %v1853_v63 = vld [vmem:[%s2397_s8 + $0x124] ss:$28 sps:$4 sm:$0xff]  }
  0x35   :  { %1709 = vmatpush3.bf16.msra.mxu1 %v1810_v7  ;;  %v1818_v7 = vld [vmem:[%s2397_s8] ss:$28 sps:$4 sm:$0xff]  }
  0x36   :  { %1710 = vmatprep.subr.bf16.mxu1 %v1915_v45 }
  0x37   :  { %1664 = vmatpush3.bf16.msra.mxu0 %v1802_v0  ;;  %v1851_v0 = vld [vmem:[%s2397_s8 + $0x120] ss:$28 sps:$4 sm:$0xff]  }
  0x38   :  { %1665 = vmatprep.subr.bf16.mxu0 %v1803_v1  ;;  %v1859_v1 = vld [vmem:[%s2397_s8 + $0x15c] ss:$28 sps:$4 sm:$0xff]  }
  0x39   :  { %1711 = vmatpush3.bf16.msra.mxu1 %v1811_v8 }
  0x3a   :  { %1712 = vmatprep.subr.bf16.mxu1 %v1915_v45 }
  0x3b   :  { %1666 = vmatpush3.bf16.msra.mxu0 %v1804_v2  ;;  %v1857_v2 = vld [vmem:[%s2397_s8 + $0x158] ss:$28 sps:$4 sm:$0xff]  }
  0x3c   :  { %1667 = vmatprep.subr.bf16.mxu0 %v1805_v3  ;;  %v773_v3 = vld [vmem:[%s2398_s1] sm:$0x3] }
  0x3d   :  { %1713 = vmatpush3.bf16.msra.mxu1 %v1812_v9  ;;  %v1826_v9 = vld [vmem:[%s2397_s8 + $0x3c] ss:$28 sps:$4 sm:$0xff]  }
  0x3e   :  { %1714 = vmatprep.subr.bf16.mxu1 %v1915_v45 }
  0x3f   :  { %1668 = vmatpush3.bf16.msra.mxu0 %v1806_v4 }
  0x40   :  { %1724 = vmatprep.subr.bf16.mxu0 %v1915_v45 }
  0x41   :  { %1715 = vmatpush3.bf16.msra.mxu1 %v1813_v10  ;;  %v1824_v10 = vld [vmem:[%s2397_s8 + $0x38] ss:$28 sps:$4 sm:$0xff]  }
  0x42   :  { %610 = vmatmul.mubr.bf16.vlgmr.msra.gmra.mrb[4].mxu0 %v175_v57  ;;  %1716 = vmatprep.subr.bf16.mxu1 %v1915_v45  ;;  %v1835_v57 = vld [vmem:[%s2397_s8 + $0x7c] ss:$28 sps:$4 sm:$0xff]  }
  0x43   :  { %1728 = vmatprep.mubr.msk.bf16.mxu0 %vm1916_vm0, %v1915_v45  ;;  %1725 = vmatpush3.bf16.msra.mxu0 %v1816_v40  ;;  %v1873_v40 = vld [vmem:[%s2397_s8 + $0x50] ss:$28 sps:$4 sm:$0xff]  }
  0x44   :  { %1726 = vmatprep.subr.bf16.mxu0 %v1915_v45 }
  0x45   :  { %1717 = vmatpush3.bf16.msra.mxu1 %v1814_v11  ;;  %v1832_v11 = vld [vmem:[%s2397_s8 + $0x74] ss:$28 sps:$4 sm:$0xff]  }
  0x46   :  { %1718 = vmatprep.subr.bf16.mxu1 %v1915_v45 }
  0x47   :  { %1727 = vmatpush3.bf16.msra.mxu0 %v1817_v50  ;;  %v1885_v50 = vld [vmem:[%s2397_s8 + $0xf8] ss:$28 sps:$4 sm:$0xff]  }
  0x48   :  { %1239 = vmatprep.subr.bf16.mxu0 %v1820_v51  ;;  %v1888_v51 = vld [vmem:[%s2397_s8 + $0x12c] ss:$28 sps:$4 sm:$0xff]  }
  0x49   :  { %1719 = vmatpush3.bf16.msra.mxu1 %v1815_v12  ;;  %v1830_v12 = vld [vmem:[%s2397_s8 + $0x70] ss:$28 sps:$4 sm:$0xff]  }
  0x4a   :  { %1280 = vmatprep.subr.bf16.mxu1 %v1823_v53  ;;  %v1889_v53 = vld [vmem:[%s2397_s8 + $0x130] ss:$28 sps:$4 sm:$0xff]  }
  0xf5   :  { %v1625_v13 = vpop.f32.mrb[0].mxu0 }
  0xf6   :  { %v1626_v15 = vpop.f32.mrb[1].mxu0 }
  0xf7   :  { %v1627_v16 = vadd.f32 %v1626_v15, %v1625_v13  ;;  %v1628_v17 = vpop.f32.mrb[2].mxu0  ;;  %v1647_v18 = vpop.f32.mrb[0].mxu1  ;;  %v1838_v13 = vld [vmem:[%s2397_s8 + $0xac] ss:$28 sps:$4 sm:$0xff]   ;;  %v1844_v15 = vld [vmem:[%s2397_s8 + $0xe4] ss:$28 sps:$4 sm:$0xff]  }
  0xf8   :  { %v1629_v19 = vpop.f32.mrb[3].mxu0  ;;  %v1648_v20 = vpop.f32.mrb[1].mxu1  ;;  %v1850_v17 = vld [vmem:[%s2397_s8 + $0x11c] ss:$28 sps:$4 sm:$0xff]  }
  0xf9   :  { %v532_v21 = vadd.f32 %v1627_v16, %v1489_v14  ;;  %v1649_v22 = vadd.f32 %v1648_v20, %v1647_v18  ;;  %v1650_v23 = vpop.f32.mrb[2].mxu1  ;;  %v1836_v14 = vld [vmem:[%s2397_s8 + $0xa8] ss:$28 sps:$4 sm:$0xff]   ;;  %v1842_v16 = vld [vmem:[%s2397_s8 + $0xe0] ss:$28 sps:$4 sm:$0xff]  }
  0xfa   :  { %v1651_v24 = vpop.f32.mrb[3].mxu1  ;;  %v1848_v18 = vld [vmem:[%s2397_s8 + $0x118] ss:$28 sps:$4 sm:$0xff]   ;;  %v1854_v20 = vld [vmem:[%s2397_s8 + $0x150] ss:$28 sps:$4 sm:$0xff]  }
  0xfb   :  { %v572_v25 = vadd.f32 %v1649_v22, %v532_v21  ;;  %v1856_v19 = vld [vmem:[%s2397_s8 + $0x154] ss:$28 sps:$4 sm:$0xff]   ;;  %v1862_v21 = vld [vmem:[%s2397_s8 + $0x18c] ss:$28 sps:$4 sm:$0xff]  }
  0xfc   :  { %v1865_v22 = vld [vmem:[%s2397_s8 + $0x194] ss:$28 sps:$4 sm:$0xff]   ;;  %v1860_v23 = vld [vmem:[%s2397_s8 + $0x188] ss:$28 sps:$4 sm:$0xff]  }
  0xfd   :  { %v1863_v24 = vld [vmem:[%s2397_s8 + $0x190] ss:$28 sps:$4 sm:$0xff]  }
  0xff   :  { %v651_v26 = vpop.f32.mrb[4].mxu1 }
 0x100   :  { %v1702_v27 = vpop.f32.mrb[5].mxu1 }
 0x101   :  { %v654_v28 = vpop.f32.mrb[6].mxu1  ;;  %v1549_v27 = vld [vmem:[%s2399_s7] ss:$0 sm:$0xff] }
 0x102   :  { %v1703_v30 = vpop.f32.mrb[7].mxu1 }
 0x115   :  { %v1669_v31 = vpop.f32.mrb[4].mxu0 }
 0x116   :  { %v1670_v32 = vpop.f32.mrb[5].mxu0 }
 0x117   :  { %v1671_v33 = vadd.f32 %v1670_v32, %v1669_v31  ;;  %v1672_v34 = vpop.f32.mrb[6].mxu0 }
 0x118   :  { %v1673_v35 = vpop.f32.mrb[7].mxu0 }
 0x119   :  { %v612_v36 = vadd.f32 %v1671_v33, %v572_v25  ;;  %v1868_v25 = vld [vmem:[%s2397_s8 + $0x14] ss:$28 sps:$4 sm:$0xff]  }
 0x11a   :  { %v1866_v35 = vld [vmem:[%s2397_s8 + $0x10] ss:$28 sps:$4 sm:$0xff]  }
 0x11b   :  { %v652_v37 = vadd.f32 %v651_v26, %v612_v36  ;;  %v1918_v26 = vmov 0   ;;  %v1869_v36 = vld [vmem:[%s2397_s8 + $0x18] ss:$28 sps:$4 sm:$0xff]  }
 0x11d   :  { %v657_v38 = vmax.f32 %v652_v37, 0.0 }
 0x11f   :  { %v658_v39 = vpack.c.bf16 %v657_v38, %v657_v38  ;;  %v1872_v38 = vld [vmem:[%s2397_s8 + $0x4c] ss:$28 sps:$4 sm:$0xff]  }
 0x121   :  { %1721 = vmatmul.mubr.bf16.vlgmr.msra.gmra.mrb[8].mxu1 %v658_v39  ;;  %v1870_v39 = vld [vmem:[%s2397_s8 + $0x48] ss:$28 sps:$4 sm:$0xff]  }
 0x122   :  { %1281 = vmatpush1.bf16.msra.mxu1 %v1821_v52  ;;  %1312 = vmatprep.mubr.bf16.mxu1 %v1918_v26  ;;  %v1886_v52 = vld [vmem:[%s2397_s8 + $0x128] ss:$28 sps:$4 sm:$0xff]  }
 0x123   :  { %1282 = vmatprep.subr.bf16.mxu1 %v1829_v56  ;;  %v1893_v56 = vld [vmem:[%s2397_s8 + $0x168] ss:$28 sps:$4 sm:$0xff]  }
 0x126   :  { %1283 = vmatpush1.bf16.msra.mxu1 %v1827_v54  ;;  %v1892_v54 = vld [vmem:[%s2397_s8 + $0x164] ss:$28 sps:$4 sm:$0xff]  }
 0x127   :  { %1284 = vmatprep.subr.bf16.mxu1 %v1835_v57  ;;  %v1896_v57 = vld [vmem:[%s2397_s8 + $0x19c] ss:$28 sps:$4 sm:$0xff]  }
 0x12a   :  { %1285 = vmatpush1.bf16.msra.mxu1 %v1833_v58  ;;  %v1894_v58 = vld [vmem:[%s2397_s8 + $0x198] ss:$28 sps:$4 sm:$0xff]  }
 0x12b   :  { %1286 = vmatprep.subr.bf16.mxu1 %v1841_v59  ;;  %v1897_v59 = vld [vmem:[%s2397_s8 + $0x1a0] ss:$28 sps:$4 sm:$0xff]  }
 0x12e   :  { %1287 = vmatpush1.bf16.msra.mxu1 %v1839_v60  ;;  %v918_v60 = vsub.s32 0, %v2055_v29 }
 0x12f   :  { %1288 = vmatprep.subr.bf16.mxu1 %v1847_v61  ;;  %v926_v61 = vsub.s32 2, %v2055_v29 }
 0x132   :  { %1289 = vmatpush1.bf16.msra.mxu1 %v1845_v62  ;;  %v914_v62 = vld [vmem:[%s2400_s9] sm:$0x7f] }
 0x133   :  { %1290 = vmatprep.subr.bf16.mxu1 %v1853_v63  ;;  %v922_v63 = vsub.s32 1, %v2055_v29 }
 0x136   :  { %1291 = vmatpush1.bf16.msra.mxu1 %v1851_v0  ;;  %v930_v0 = vsub.s32 3, %v2055_v29 }
 0x137   :  { %1292 = vmatprep.subr.bf16.mxu1 %v1859_v1  ;;  %v919_v1 = vrot.slane %v914_v62, %v918_v60 }
 0x13a   :  { %1293 = vmatpush1.bf16.msra.mxu1 %v1857_v2  ;;  %v927_v2 = vrot.slane %v914_v62, %v926_v61 }
 0x13b   :  { %1294 = vmatprep.subr.bf16.mxu1 %v1865_v22 }
 0x13e   :  { %1295 = vmatpush1.bf16.msra.mxu1 %v1863_v24 }
 0x13f   :  { %1732 = vmatprep.subr.bf16.mxu1 %v1915_v45 }
 0x1f4   :  { %v764_v42 = vpop.f32.mrb[8].mxu1 }
 0x1f5   :  { %v765_v43 = vadd.f32 %v1540_v41, %v764_v42  ;;  %v1722_v44 = vpop.f32.mrb[9].mxu1  ;;  %v1876_v41 = vld [vmem:[%s2397_s8 + $0x84] ss:$28 sps:$4 sm:$0xff]  }
 0x1f6   :  { %v767_v46 = vpop.f32.mrb[10].mxu1  ;;  %v1874_v42 = vld [vmem:[%s2397_s8 + $0x80] ss:$28 sps:$4 sm:$0xff]  }
 0x1f7   :  { %v770_v47 = vmul.f32 0.5, %v765_v43  ;;  %1480 = vst.msk [vmem:[%s2396_s11] sm:$0x3] %vm1479_vm2, %v765_v43  ;;  %v1723_v48 = vpop.f32.mrb[11].mxu1  ;;  %v1880_v44 = vld [vmem:[%s2397_s8 + $0xbc] ss:$28 sps:$4 sm:$0xff]  }
 0x1f8   :  { %v1878_v46 = vld [vmem:[%s2397_s8 + $0xb8] ss:$28 sps:$4 sm:$0xff]  }
 0x1f9   :  { %v771_v49 = vmul.f32 1.442695, %v770_v47  ;;  %v1881_v47 = vld [vmem:[%s2397_s8 + $0xc0] ss:$28 sps:$4 sm:$0xff]   ;;  %v1884_v48 = vld [vmem:[%s2397_s8 + $0xf4] ss:$28 sps:$4 sm:$0xff]  }
 0x1fb   :  { %1898 = vpow2.f32 %v771_v49  ;;  %v1882_v49 = vld [vmem:[%s2397_s8 + $0xf0] ss:$28 sps:$4 sm:$0xff]  }
 0x205   :  { %v1899_v55 = vpop.eup %1898 }
 0x206   :  { %775 = vrot.lane.b32.xlu0 %v1899_v55, %s1917_s28  ;;  %v1890_v55 = vld [vmem:[%s2397_s8 + $0x160] ss:$28 sps:$4 sm:$0xff]  }
 0x278   :  { %v776_v4 = vpop.permute.xlu0 %775 }
 0x279   :  { %v778_v5 = vmul.f32 %v776_v4, %v773_v3  ;;  %v923_v3 = vrot.slane %v914_v62, %v922_v63 }
 0x27b   :  { %v779_v6 = vadd.f32 %v778_v5, %v765_v43  ;;  %v1877_v43 = vld [vmem:[%s2397_s8 + $0x88] ss:$28 sps:$4 sm:$0xff]  }
 0x27d   :  { %v780_v8 = vpack.c.bf16 %v779_v6, %v779_v6 }
 0x27f   :  { %1729 = vmatmul.mubr.msk.bf16.vlgmr.msra.gmra.mrb[8].mxu0 %vm804_vm3, %v780_v8 }
 0x280   :  { %1240 = vmatpush1.bf16.msra.mxu0 %v1818_v7  ;;  %1271 = vmatprep.mubr.bf16.mxu0 %v1918_v26 }
 0x281   :  { %1241 = vmatprep.subr.bf16.mxu0 %v1826_v9 }
 0x284   :  { %1242 = vmatpush1.bf16.msra.mxu0 %v1824_v10 }
 0x285   :  { %1243 = vmatprep.subr.bf16.mxu0 %v1832_v11 }
 0x288   :  { %1244 = vmatpush1.bf16.msra.mxu0 %v1830_v12 }
 0x289   :  { %1245 = vmatprep.subr.bf16.mxu0 %v1838_v13 }
 0x28c   :  { %1246 = vmatpush1.bf16.msra.mxu0 %v1836_v14 }
 0x28d   :  { %1247 = vmatprep.subr.bf16.mxu0 %v1844_v15 }
 0x290   :  { %1248 = vmatpush1.bf16.msra.mxu0 %v1842_v16 }
 0x291   :  { %1249 = vmatprep.subr.bf16.mxu0 %v1850_v17 }
 0x294   :  { %1250 = vmatpush1.bf16.msra.mxu0 %v1848_v18 }
 0x295   :  { %1251 = vmatprep.subr.bf16.mxu0 %v1856_v19 }
 0x298   :  { %1252 = vmatpush1.bf16.msra.mxu0 %v1854_v20  ;;  %v1919_v20 = vmov 1983009808  }
 0x299   :  { %1253 = vmatprep.subr.bf16.mxu0 %v1862_v21  ;;  %v1440_v21 = vunpack.c.l.s4 %v1919_v20 }
 0x29c   :  { %1254 = vmatpush1.bf16.msra.mxu0 %v1860_v23 }
 0x29d   :  { %1321 = vmatprep.subr.bf16.mxu0 %v1868_v25  ;;  %v1441_v25 = vunpack.c.0.s8 %v1440_v21 }
 0x352   :  { %v842_v28 = vpop.f32.mrb[8].mxu0 }
 0x353   :  { %v843_v30 = vadd.f32 %v1549_v27, %v842_v28  ;;  %v1730_v31 = vpop.f32.mrb[9].mxu0 }
 0x354   :  { %v845_v32 = vpop.f32.mrb[10].mxu0 }
 0x355   :  { %v848_v33 = vmax.f32 %v843_v30, 0.0  ;;  %v1731_v34 = vpop.f32.mrb[11].mxu0 }
 0x357   :  { %v849_v37 = vpack.c.bf16 %v848_v33, %v848_v33 }
 0x359   :  { %1272 = vmatmul.mubr.bf16.vlgmr.msra.gmra.mrb[12].mxu0 %v849_v37  ;;  %1313 = vmatmul.mubr.bf16.vlgmr.msra.gmra.mrb[12].mxu1 %v849_v37 }
 0x35a   :  { %1322 = vmatpush1.bf16.msra.mxu0 %v1866_v35  ;;  %1733 = vmatpush3.bf16.msra.mxu1 %v1869_v36  ;;  %v1444_v35 = vsub.s32 %v1441_v25, %v2055_v29 }
 0x35b   :  { %1323 = vmatprep.subr.bf16.mxu0 %v1872_v38  ;;  %1734 = vmatprep.subr.bf16.mxu1 %v1915_v45 }
 0x35c   :  { %1353 = vmatprep.mubr.bf16.mxu0 %v1918_v26  ;;  %1748 = vmatprep.mubr.msk.bf16.mxu1 %vm1916_vm0, %v1915_v45 }
 0x35e   :  { %1324 = vmatpush1.bf16.msra.mxu0 %v1870_v39  ;;  %1735 = vmatpush3.bf16.msra.mxu1 %v1873_v40 }
 0x35f   :  { %1325 = vmatprep.subr.bf16.mxu0 %v1876_v41  ;;  %1736 = vmatprep.subr.bf16.mxu1 %v1915_v45  ;;  %v934_v41 = vsub.s32 4, %v2055_v29 }
 0x362   :  { %1326 = vmatpush1.bf16.msra.mxu0 %v1874_v42  ;;  %1737 = vmatpush3.bf16.msra.mxu1 %v1877_v43  ;;  %v942_v42 = vsub.s32 6, %v2055_v29  ;;  %v938_v43 = vsub.s32 5, %v2055_v29 }
 0x363   :  { %1327 = vmatprep.subr.bf16.mxu0 %v1880_v44  ;;  %1738 = vmatprep.subr.bf16.mxu1 %v1915_v45 }
 0x366   :  { %1328 = vmatpush1.bf16.msra.mxu0 %v1878_v46  ;;  %1739 = vmatpush3.bf16.msra.mxu1 %v1881_v47  ;;  %v935_v46 = vrot.slane %v914_v62, %v934_v41  ;;  %v943_v47 = vrot.slane %v914_v62, %v942_v42 }
 0x367   :  { %1329 = vmatprep.subr.bf16.mxu0 %v1884_v48  ;;  %1740 = vmatprep.subr.bf16.mxu1 %v1915_v45  ;;  %v939_v48 = vrot.slane %v914_v62, %v938_v43 }
 0x36a   :  { %1330 = vmatpush1.bf16.msra.mxu0 %v1882_v49  ;;  %1741 = vmatpush3.bf16.msra.mxu1 %v1885_v50 }
 0x36b   :  { %1331 = vmatprep.subr.bf16.mxu0 %v1888_v51  ;;  %1742 = vmatprep.subr.bf16.mxu1 %v1915_v45 }
 0x36e   :  { %1332 = vmatpush1.bf16.msra.mxu0 %v1886_v52  ;;  %1743 = vmatpush3.bf16.msra.mxu1 %v1889_v53 }
 0x36f   :  { %1333 = vmatprep.subr.bf16.mxu0 %v1892_v54  ;;  %1744 = vmatprep.subr.bf16.mxu1 %v1915_v45 }
 0x372   :  { %1334 = vmatpush1.bf16.msra.mxu0 %v1890_v55  ;;  %1745 = vmatpush3.bf16.msra.mxu1 %v1893_v56 }
 0x373   :  { %1335 = vmatprep.subr.bf16.mxu0 %v1896_v57  ;;  %1746 = vmatprep.subr.bf16.mxu1 %v1915_v45  ;;  %v931_v45 = vrot.slane %v914_v62, %v930_v0 }
 0x376   :  { %1336 = vmatpush1.bf16.msra.mxu0 %v1894_v58  ;;  %1747 = vmatpush3.bf16.msra.mxu1 %v1897_v59 }
 0x379   :  { %1354 = vmatmul.mubr.bf16.vlgmr.msra.gmra.mrb[16].mxu0 %v849_v37  ;;  %1749 = vmatmul.mubr.bf16.vlgmr.msra.gmra.mrb[16].mxu1 %v849_v37 }
 0x42c   :  { %v1273_v4 = vpop.f32.mrb[12].mxu0  ;;  %v1314_v5 = vpop.f32.mrb[12].mxu1 }
 0x42d   :  { %v1274_v6 = vadd.f32 %v1273_v4, %v919_v1  ;;  %v1315_v7 = vadd.f32 %v1314_v5, %v927_v2  ;;  %v1275_v8 = vpop.f32.mrb[13].mxu0  ;;  %v1316_v9 = vpop.f32.mrb[13].mxu1 }
 0x42e   :  { %v1276_v10 = vadd.f32 %v1275_v8, %v923_v3  ;;  %v1317_v11 = vadd.f32 %v1316_v9, %v931_v45  ;;  %v1277_v12 = vpop.f32.mrb[14].mxu0  ;;  %v1318_v13 = vpop.f32.mrb[14].mxu1 }
 0x42f   :  { %v1402_v14 = vmul.f32 0.5, %v1274_v6  ;;  %v1404_v15 = vmul.f32 0.5, %v1315_v7  ;;  %v1278_v16 = vpop.f32.mrb[15].mxu0  ;;  %v1319_v17 = vpop.f32.mrb[15].mxu1 }
 0x430   :  { %v1403_v18 = vmul.f32 0.5, %v1276_v10  ;;  %v1405_v19 = vmul.f32 0.5, %v1317_v11 }
 0x431   :  { %1900 = vtanh.f32 %v1402_v14 }
 0x432   :  { %1902 = vtanh.f32 %v1404_v15 }
 0x433   :  { %1904 = vtanh.f32 %v1403_v18 }
 0x434   :  { %1906 = vtanh.f32 %v1405_v19 }
 0x43b   :  { %v1901_v22 = vpop.eup %1900 }
 0x43c   :  { %v1903_v23 = vpop.eup %1902  ;;  %v1416_v24 = vadd.f32 1.0, %v1901_v22 }
 0x43d   :  { %v1905_v26 = vpop.eup %1904  ;;  %v1418_v27 = vadd.f32 1.0, %v1903_v23 }
 0x43e   :  { %v1907_v28 = vpop.eup %1906  ;;  %v1423_v30 = vmul.f32 0.5, %v1416_v24  ;;  %v1417_v31 = vadd.f32 1.0, %v1905_v26 }
 0x43f   :  { %v1425_v32 = vmul.f32 0.5, %v1418_v27  ;;  %v1419_v33 = vadd.f32 1.0, %v1907_v28 }
 0x440   :  { %v1424_v34 = vmul.f32 0.5, %v1417_v31 }
 0x441   :  { %v1426_v36 = vmul.f32 0.5, %v1419_v33 }
 0x442   :  { %v1437_v37 = vcombine.low %v1423_v30, %v1424_v34 }
 0x443   :  { %v1438_v38 = vcombine.low %v1425_v32, %v1426_v36 }
 0x444   :  { %v1445_v39 = vrot.slane %v1437_v37, %v1444_v35 }
 0x445   :  { %v1452_v40 = vrot.slane %v1438_v38, %v1444_v35 }
 0x447   :  { %v1453_v44 = vcombine.low %v1445_v39, %v1452_v40 }
 0x449   :  { %1472 = vst [vmem:[%s2401_s10] sm:$0xff] %v1453_v44 }
 0x44c   :  { %v1355_v49 = vpop.f32.mrb[16].mxu0  ;;  %v1396_v50 = vpop.f32.mrb[16].mxu1 }
 0x44d   :  { %v1356_v51 = vadd.f32 %v1355_v49, %v935_v46  ;;  %v1397_v52 = vadd.f32 %v1396_v50, %v943_v47  ;;  %v1357_v53 = vpop.f32.mrb[17].mxu0  ;;  %v1750_v54 = vpop.f32.mrb[17].mxu1 }
 0x44e   :  { %v1358_v55 = vadd.f32 %v1357_v53, %v939_v48  ;;  %v1359_v56 = vpop.f32.mrb[18].mxu0  ;;  %v1399_v57 = vpop.f32.mrb[18].mxu1 }
 0x44f   :  { %v1406_v58 = vmul.f32 0.5, %v1356_v51  ;;  %v1408_v59 = vmul.f32 0.5, %v1397_v52  ;;  %v1360_v29 = vpop.f32.mrb[19].mxu0  ;;  %v1751_v60 = vpop.f32.mrb[19].mxu1 }
 0x450   :  { %v1407_v61 = vmul.f32 0.5, %v1358_v55 }
 0x451   :  { %1908 = vtanh.f32 %v1406_v58 }
 0x452   :  { %1910 = vtanh.f32 %v1408_v59 }
 0x453   :  { %1912 = vtanh.f32 %v1407_v61 }
 0x45b   :  { %v1909_v63 = vpop.eup %1908 }
 0x45c   :  { %v1911_v0 = vpop.eup %1910  ;;  %v1420_v62 = vadd.f32 1.0, %v1909_v63 }
 0x45d   :  { %v1913_v1 = vpop.eup %1912  ;;  %v1422_v2 = vadd.f32 1.0, %v1911_v0 }
 0x45e   :  { %v1427_v3 = vmul.f32 0.5, %v1420_v62  ;;  %v1421_v45 = vadd.f32 1.0, %v1913_v1 }
 0x45f   :  { %v1429_v4 = vmul.f32 0.5, %v1422_v2 }
 0x460   :  { %v1428_v5 = vmul.f32 0.5, %v1421_v45 }
 0x461   :  { %v1468_v7 = vrot.slane %v1429_v4, %v1444_v35 }
 0x462   :  { %v1454_v6 = vcombine.low %v1427_v3, %v1428_v5 }
 0x464   :  { %v1461_v8 = vrot.slane %v1454_v6, %v1444_v35 }
 0x466   :  { %v1469_v9 = vcombine.low %v1461_v8, %v1468_v7 }
 0x468   :  { %1478 = vst.msk [vmem:[%s2401_s10 + $0x8] sm:$0x3f] %vm1477_vm8, %v1469_v9 }

</bundles_post_ra>
